<compile_context>
chip_gen: v7x
topology: tpu7x:2x2x1
jax: 0.10.0
libtpu: 0.0.40
codegen_flags: <defaults>
</compile_context>

<pallas_src>
import functools

import jax
import jax.numpy as jnp
from jax import lax
from jax.experimental import pallas as pl
from jax.experimental.pallas import tpu as pltpu

LANES = 128
SUBLANES = 8
TILE_ROWS_MAX = 2048      # (2048, 128) f32 block = 1 MiB per input per step
CHUNK_ROWS = 256          # in-kernel accumulation chunk (128 KiB f32 temporaries)
MIN_BLOCKS = 4            # keep >=4 grid steps: pipelining + v7x 2-TC split
MIN_KERNEL_ELEMS = 65536  # below this, pallas_call fixed cost dominates


def _round_up(n, m):
    return ((n + m - 1) // m) * m


def _pow(base, gamma):
    """(1-pt)**gamma without pow->exp/log for integral gamma."""
    g = float(gamma)
    if g == int(g):
        return lax.integer_pow(base, int(g))
    # Non-integral gamma: avoid NaN/inf intermediates at base == 0.
    return jnp.where(base > 0.0, jnp.power(base, jnp.float32(g)), 0.0)


def _focal_terms(x, t, gamma, logits, hard_targets=False):
    """Elementwise focal loss (f32 in, f32 out). Shared by kernel / ref / tail."""
    if hard_targets:
        # Fast path assuming targets in {0, 1}: fewer EUP (transcendental) ops.
        if logits:
            z = jnp.where(t > 0.5, x, -x)
            e = jnp.exp(-jnp.abs(z))
            bce = jnp.maximum(-z, 0.0) + jnp.log1p(e)          # 1 exp + 1 log
            inv = 1.0 / (1.0 + e)
            omp = jnp.where(z >= 0.0, e, 1.0) * inv            # = 1 - sigmoid(z)
        else:
            pt = jnp.where(t > 0.5, x, 1.0 - x)
            bce = -jnp.maximum(jnp.log(pt), -100.0)            # 1 log
            omp = 1.0 - pt
    else:
        if logits:
            # binary_cross_entropy_with_logits, reduction='none'
            bce = jnp.maximum(x, 0.0) - x * t + jnp.log1p(jnp.exp(-jnp.abs(x)))
        else:
            # binary_cross_entropy, reduction='none' (PyTorch clamps logs at -100)
            log_p = jnp.maximum(jnp.log(x), -100.0)
            log_1mp = jnp.maximum(jnp.log(1.0 - x), -100.0)
            bce = -(t * log_p + (1.0 - t) * log_1mp)
        pt = jnp.exp(-bce)
        omp = 1.0 - pt
    return _pow(omp, gamma) * bce


def _block_partial_sum(x_ref, t_ref, *, row_base, rows, tile_rows, chunk_rows,
                       gamma, logits, hard_targets, masked):
    """(8,128) f32 partial sum of the focal loss over one (tile_rows,128) block."""
    n_chunks = tile_rows // chunk_rows

    def one_chunk(x, t, r_start):
        x = x.astype(jnp.float32)
        t = t.astype(jnp.float32)
        if masked:
            ridx = r_start + lax.broadcasted_iota(
                jnp.int32, (chunk_rows, LANES), 0)
            valid = ridx < rows
            # Keep padded garbage out of log/exp (avoid NaN/inf), zero it below.
            x = jnp.where(valid, x, 0.5)
            t = jnp.where(valid, t, 0.5)
        f = _focal_terms(x, t, gamma, logits, hard_targets)
        if masked:
            f = jnp.where(valid, f, 0.0)
        # Sublane-block reduction only (pure VALU adds, no cross-lane XLU).
        return jnp.sum(f.reshape(chunk_rows // SUBLANES, SUBLANES, LANES), axis=0)

    if n_chunks == 1:
        return one_chunk(x_ref[...], t_ref[...], row_base)

    def body(c, acc):
        r0 = pl.multiple_of(c * chunk_rows, chunk_rows)
        return acc + one_chunk(x_ref[pl.ds(r0, chunk_rows), :],
                               t_ref[pl.ds(r0, chunk_rows), :],
                               row_base + r0)

    return lax.fori_loop(0, n_chunks, body,
                         jnp.zeros((SUBLANES, LANES), jnp.float32))


def _focal_partial_kernel(x_ref, t_ref, out_ref, *, gamma, logits, hard_targets,
                          rows, tile_rows, chunk_rows):
    i = pl.program_id(0)
    kw = dict(row_base=i * tile_rows, rows=rows, tile_rows=tile_rows,
              chunk_rows=chunk_rows, gamma=gamma, logits=logits,
              hard_targets=hard_targets)

    ragged = (rows % tile_rows) != 0  # static: only the last block can be padded
    if ragged:
        last = pl.num_programs(0) - 1

        @pl.when(i == last)
        def _():
            out_ref[...] = _block_partial_sum(x_ref, t_ref, masked=True, **kw)

        @pl.when(i != last)
        def _():
            out_ref[...] = _block_partial_sum(x_ref, t_ref, masked=False, **kw)
    else:
        out_ref[...] = _block_partial_sum(x_ref, t_ref, masked=False, **kw)


def _choose_tiles(rows, tile_rows_max):
    """Pick (tile_rows, chunk_rows): big blocks, but >= MIN_BLOCKS grid steps."""
    t = min(tile_rows_max, _round_up(pl.cdiv(rows, MIN_BLOCKS), SUBLANES))
    t = max(t, SUBLANES)
    if t > CHUNK_ROWS:
        t = (t // CHUNK_ROWS) * CHUNK_ROWS  # multiple of the inner chunk
        return t, CHUNK_ROWS
    return t, t


def focal_loss(outputs, targets, *, gamma=2, logits=False, reduce=True,
               hard_targets=False, tile_rows_max=TILE_ROWS_MAX,
               min_kernel_elems=MIN_KERNEL_ELEMS):
    """Focal loss matching TorchFocalLoss.forward (mean over all elements).

    Inputs may be any float dtype (bf16 halves HBM traffic); math is f32.
    `hard_targets=True` is an opt-in fast path valid when targets are in {0,1}.
    """
    assert outputs.shape == targets.shape

    if not reduce:
        # TODO(synk): reduce=False (elementwise) path kept in plain JAX.
        return _focal_terms(outputs.astype(jnp.float32),
                            targets.astype(jnp.float32), gamma, logits,
                            hard_targets)

    n_elems = outputs.size
    if n_elems < min_kernel_elems:
        # Pure-JAX fallback: pallas_call fixed cost dominates for tiny inputs.
        return jnp.mean(_focal_terms(outputs.astype(jnp.float32),
                                     targets.astype(jnp.float32), gamma, logits,
                                     hard_targets))

    x = outputs.reshape(-1)  # free reshape, keep native dtype (no upcast copy)
    t = targets.reshape(-1)

    rows = n_elems // LANES
    rem = n_elems - rows * LANES

    total = jnp.float32(0.0)

    if rows > 0:
        if rem == 0:
            x2 = x.reshape(rows, LANES)          # bitcast reshape, no copy
            t2 = t.reshape(rows, LANES)
        else:
            # Rare (n % 128 != 0): allow_input_fusion lets XLA fuse this
            # slice+reshape into the pallas operands instead of copying.
            x2 = x[:rows * LANES].reshape(rows, LANES)
            t2 = t[:rows * LANES].reshape(rows, LANES)

        tile_rows, chunk_rows = _choose_tiles(rows, tile_rows_max)
        n_blocks = pl.cdiv(rows, tile_rows)

        kernel = functools.partial(
            _focal_partial_kernel, gamma=gamma, logits=logits,
            hard_targets=hard_targets, rows=rows, tile_rows=tile_rows,
            chunk_rows=chunk_rows)

        partials = pl.pallas_call(
            kernel,
            out_shape=jax.ShapeDtypeStruct((n_blocks * SUBLANES, LANES),
                                           jnp.float32),
            grid_spec=pltpu.PrefetchScalarGridSpec(
                num_scalar_prefetch=0,
                grid=(n_blocks,),
                in_specs=[
                    pl.BlockSpec((tile_rows, LANES), lambda i: (i, 0)),
                    pl.BlockSpec((tile_rows, LANES), lambda i: (i, 0)),
                ],
                out_specs=pl.BlockSpec((SUBLANES, LANES), lambda i: (i, 0)),
            ),
            compiler_params=pltpu.CompilerParams(
                dimension_semantics=("parallel",),
                allow_input_fusion=([True, True] if rem else None),
            ),
        )(x2, t2)

        total = total + jnp.sum(partials, dtype=jnp.float32)

    if rem > 0:
        xt = x[rows * LANES:].astype(jnp.float32)
        tt = t[rows * LANES:].astype(jnp.float32)
        total = total + jnp.sum(_focal_terms(xt, tt, gamma, logits, hard_targets))

    return total / jnp.float32(n_elems)


def focal_loss_ref(outputs, targets, *, gamma=2, logits=False):
    """Pure-JAX reference mirroring the PyTorch module (reduce=True)."""
    return jnp.mean(_focal_terms(outputs.astype(jnp.float32),
                                 targets.astype(jnp.float32), gamma, logits))


if __name__ == "__main__":
    key = jax.random.PRNGKey(0)
    ks = jax.random.split(key, 8)

    # Case 1: small NCHW probabilities; force the kernel path (jitted).
    shape1 = (2, 4, 16, 16)
    probs1 = jax.nn.sigmoid(jax.random.normal(ks[0], shape1, jnp.float32))
    tgts1 = (jax.random.uniform(ks[1], shape1) > 0.5).astype(jnp.float32)
    f1 = jax.jit(functools.partial(focal_loss, min_kernel_elems=0))
    out1 = jax.block_until_ready(f1(probs1, tgts1))
    ref1 = focal_loss_ref(probs1, tgts1)
    assert jnp.allclose(out1, ref1, rtol=1e-5, atol=1e-6), (out1, ref1)

    # Case 2: awkward size -> ragged last block mask + plain-JAX lane tail.
    shape2 = (5, 5, 11, 13)
    probs2 = jax.nn.sigmoid(jax.random.normal(ks[2], shape2, jnp.float32))
    tgts2 = (jax.random.uniform(ks[3], shape2) > 0.5).astype(jnp.float32)
    out2 = jax.block_until_ready(focal_loss(probs2, tgts2, min_kernel_elems=0))
    ref2 = focal_loss_ref(probs2, tgts2)
    assert jnp.allclose(out2, ref2, rtol=1e-5, atol=1e-6), (out2, ref2)

    # Case 3: logits=True path.
    raw3 = jax.random.normal(ks[4], shape1, jnp.float32) * 3.0
    out3 = jax.block_until_ready(
        focal_loss(raw3, tgts1, logits=True, min_kernel_elems=0))
    ref3 = focal_loss_ref(raw3, tgts1, logits=True)
    assert jnp.allclose(out3, ref3, rtol=1e-5, atol=1e-6), (out3, ref3)

    # Case 4: larger input (kernel by default), bf16 inputs, chunked inner loop
    # (tile_rows > CHUNK_ROWS) and the hard-target fast path.
    shape4 = (4, 4, 128, 128)
    probs4 = jax.nn.sigmoid(jax.random.normal(ks[5], shape4, jnp.float32))
    tgts4 = (jax.random.uniform(ks[6], shape4) > 0.5).astype(jnp.float32)
    f4 = jax.jit(functools.partial(focal_loss, hard_targets=True))
    out4 = jax.block_until_ready(f4(probs4.astype(jnp.bfloat16),
                                    tgts4.astype(jnp.bfloat16)))
    ref4 = focal_loss_ref(probs4.astype(jnp.bfloat16), tgts4.astype(jnp.bfloat16))
    assert jnp.allclose(out4, ref4, rtol=2e-3, atol=2e-4), (out4, ref4)

    # Case 5: tiny input takes the pure-JAX fallback (below min_kernel_elems).
    out5 = jax.block_until_ready(focal_loss(probs1, tgts1))
    assert jnp.allclose(out5, ref1, rtol=1e-5, atol=1e-6), (out5, ref1)

    print("KERNEL_OK")
</pallas_src>

<mosaic_0001>
module attributes {stable_mosaic.version = 11 : i64} {
  func.func @_focal_partial_kernel(%arg0: i32, %arg1: memref<8x128xf32, #tpu.memory_space<vmem>>, %arg2: memref<8x128xf32, #tpu.memory_space<vmem>>, %arg3: memref<8x128xf32, #tpu.memory_space<vmem>>) attributes {dimension_semantics = [#tpu.dimension_semantics<parallel>], iteration_bounds = array<i64: 2>, scalar_prefetch = 0 : i64, scratch_operands = 0 : i64, tpu.core_type = #tpu.core_type<tc>, window_params = [{transform_indices = @transform_0, window_bounds = array<i64: 8, 128>}, {transform_indices = @transform_1, window_bounds = array<i64: 8, 128>}, {transform_indices = @transform_2, window_bounds = array<i64: 8, 128>}]} {
    %c0 = arith.constant 0 : index
    %c0_0 = arith.constant 0 : index
    %0 = vector.load %arg1[%c0, %c0_0] : memref<8x128xf32, #tpu.memory_space<vmem>>, vector<8x128xf32>
    %c0_1 = arith.constant 0 : index
    %c0_2 = arith.constant 0 : index
    %1 = vector.load %arg2[%c0_1, %c0_2] : memref<8x128xf32, #tpu.memory_space<vmem>>, vector<8x128xf32>
    %2 = math.log %0 : vector<8x128xf32>
    %cst = arith.constant -1.000000e+02 : f32
    %3 = vector.broadcast %cst : f32 to vector<8x128xf32>
    %4 = arith.maximumf %2, %3 : vector<8x128xf32>
    %cst_3 = arith.constant 1.000000e+00 : f32
    %5 = vector.broadcast %cst_3 : f32 to vector<8x128xf32>
    %6 = arith.subf %5, %0 : vector<8x128xf32>
    %7 = math.log %6 : vector<8x128xf32>
    %cst_4 = arith.constant -1.000000e+02 : f32
    %8 = vector.broadcast %cst_4 : f32 to vector<8x128xf32>
    %9 = arith.maximumf %7, %8 : vector<8x128xf32>
    %10 = arith.mulf %1, %4 : vector<8x128xf32>
    %cst_5 = arith.constant 1.000000e+00 : f32
    %11 = vector.broadcast %cst_5 : f32 to vector<8x128xf32>
    %12 = arith.subf %11, %1 : vector<8x128xf32>
    %13 = arith.mulf %12, %9 : vector<8x128xf32>
    %14 = arith.addf %10, %13 : vector<8x128xf32>
    %cst_6 = arith.constant 0.000000e+00 : f32
    %15 = vector.broadcast %cst_6 : f32 to vector<8x128xf32>
    %16 = arith.subf %15, %14 : vector<8x128xf32>
    %cst_7 = arith.constant 0.000000e+00 : f32
    %17 = vector.broadcast %cst_7 : f32 to vector<8x128xf32>
    %18 = arith.subf %17, %16 : vector<8x128xf32>
    %19 = math.exp %18 : vector<8x128xf32>
    %cst_8 = arith.constant 1.000000e+00 : f32
    %20 = vector.broadcast %cst_8 : f32 to vector<8x128xf32>
    %21 = arith.subf %20, %19 : vector<8x128xf32>
    %22 = arith.mulf %21, %21 : vector<8x128xf32>
    %23 = arith.mulf %22, %16 : vector<8x128xf32>
    %24 = vector.shape_cast %23 : vector<8x128xf32> to vector<1x8x128xf32>
    %cst_9 = arith.constant dense<0.000000e+00> : vector<8x128xf32>
    %25 = vector.multi_reduction <add>, %24, %cst_9 [0] : vector<1x8x128xf32> to vector<8x128xf32>
    %c0_10 = arith.constant 0 : index
    %c0_11 = arith.constant 0 : index
    %26 = vector.load %arg3[%c0_10, %c0_11] : memref<8x128xf32, #tpu.memory_space<vmem>>, vector<8x128xf32>
    tpu.vector_store %arg3[%c0_10, %c0_11], %25 {strides = array<i32>} : memref<8x128xf32, #tpu.memory_space<vmem>>, vector<8x128xf32>,
    return
  }
  func.func @transform_0(%arg0: i32) -> (i32, i32) {
    %c0_i32 = arith.constant 0 : i32
    %c0_i32_0 = arith.constant 0 : i32
    return %arg0, %c0_i32 : i32, i32
  }
  func.func @transform_1(%arg0: i32) -> (i32, i32) {
    %c0_i32 = arith.constant 0 : i32
    %c0_i32_0 = arith.constant 0 : i32
    return %arg0, %c0_i32 : i32, i32
  }
  func.func @transform_2(%arg0: i32) -> (i32, i32) {
    %c0_i32 = arith.constant 0 : i32
    %c0_i32_0 = arith.constant 0 : i32
    return %arg0, %c0_i32 : i32, i32
  }
}

</mosaic_0001>

<bundles_post_ra>
// kernel: focal_loss.1
= control target key start
LH: loop header
LB: loop body
LE: loop exit
PB: predicated region body
PF: predicated region fallthrough
CT: control target
= control target key end

     0   :  { %s290_s9 = smov 0   ;;  %s310_s0 = inlined_call_operand.vmem [shape: f32[16,128], index: 0, kind: input, shape index: {}]   ;;  %s311_s1 = inlined_call_operand.vmem [shape: f32[16,128], index: 1, kind: input, shape index: {}]   ;;  %s312_s2 = inlined_call_operand.vmem [shape: f32[16,128], index: 2, kind: output, shape index: {}]  }
   0x1 LB: > { %s243_s10 = sadd.s32 4294967295, %s273_s9   ;;  %p247_p0 = scmp.ge.s32.totalorder %s273_s9, 1  ;;  %s273_s9 = sphi %s290_s9, %s12_s9  }
   0x2   : > { %p120_p1 = scmp.lt.s32.totalorder %s273_s9, 3 }
   0x4   : > { %p121_p2 = pnand %p247_p0, %p120_p1 }
   0x5   : > { %p144_p3 = scmp.lt.s32.totalorder (!%p121_p2), %s243_s10, 1 }
   0x6   : > { %124 = sbr.rel (%p121_p2) target bundleno = 62 (0x3e), region = 28 }
   0xd   : > { %s314_s10 = smov (!%p144_p3, %s243_s10), 1 }
   0xe   : > { %s248_s11 = sshll.u32 %s314_s10, 3 }
   0xf   : > { %s147_s14 = scalar_lea.vmem %s310_s0, %s248_s11  ;;  %s151_s17 = scalar_lea.vmem %s311_s1, %s248_s11 }
  0x10   : > { %v156_v0 = vld [vmem:[%s147_s14] sm:$0xff]  ;;  %s155_s20 = scalar_lea.vmem %s312_s2, %s248_s11 }
  0x11   : > { %261 = vlog2.f32 %v156_v0  ;;  %v161_v1 = vsub.f32 1.0, %v156_v0  ;;  %v157_v3 = vld [vmem:[%s151_s17] sm:$0xff] }
  0x12   : > { %v166_v8 = vsub.f32 1.0, %v157_v3 }
  0x13   : > { %263 = vlog2.f32 %v161_v1 }
  0x1b   : > { %v262_v2 = vpop.eup %261 }
  0x1c   : > { %v159_v4 = vmul.f32 0.6931472, %v262_v2 }
  0x1d   : > { %v264_v5 = vpop.eup %263 }
  0x1e   : > { %v160_v6 = vmax.f32 %v159_v4, -100.0  ;;  %v163_v7 = vmul.f32 0.6931472, %v264_v5 }
  0x20   : > { %v164_v9 = vmax.f32 %v163_v7, -100.0  ;;  %v165_v10 = vmul.f32 %v160_v6, %v157_v3 }
  0x22   : > { %v167_v11 = vmul.f32 %v166_v8, %v164_v9 }
  0x24   : > { %v168_v12 = vadd.f32 %v167_v11, %v165_v10 }
  0x26   : > { %v169_v13 = vsub.f32 0.0, %v168_v12 }
  0x28   : > { %v170_v14 = vsub.f32 0.0, %v169_v13 }
  0x2a   : > { %v171_v15 = vmul.f32 1.442695, %v170_v14 }
  0x2c   : > { %265 = vpow2.f32 %v171_v15 }
  0x36   : > { %v266_v16 = vpop.eup %265 }
  0x37   : > { %v173_v17 = vsub.f32 1.0, %v266_v16 }
  0x39   : > { %v174_v18 = vmul.f32 %v173_v17, %v173_v17 }
  0x3b   : > { %v175_v19 = vmul.f32 %v174_v18, %v169_v13 }
  0x3d   : > { %177 = vst [vmem:[%s155_s20] sm:$0xff] %v175_v19 }
  0x3e PF: > { %s12_s9 = sadd.s32 1, %s273_s9  }
  0x3f   : > { %p9_p4 = scmp.ge.s32.totalorder %s12_s9, 4  }
  0x41   :  { %11 = sbr.rel (!%p9_p4) target bundleno = 1 (0x1), region = 61 }

</bundles_post_ra>
